<compile_context>
chip_gen: v5e
topology: v5e:2x2
jax: 0.10.0
libtpu: 0.0.40
codegen_flags: <defaults>
</compile_context>

<pallas_src>
import math

import jax
import jax.numpy as jnp
from jax.experimental import pallas as pl
from jax.experimental.pallas import tpu as pltpu


# ---------------------------------------------------------------------------
# Kernels (weight already transposed to (K, N) by the wrapper)
# ---------------------------------------------------------------------------
def _mm_bias_kernel(x_ref, w_ref, b_ref, o_ref):
    # Whole reduction dim in one tile: no accumulator, single finalize.
    o_ref[...] = (
        jnp.dot(x_ref[...], w_ref[...], preferred_element_type=jnp.float32)
        + b_ref[...]
    ).astype(o_ref.dtype)


def _mm_nobias_kernel(x_ref, w_ref, o_ref):
    o_ref[...] = jnp.dot(
        x_ref[...], w_ref[...], preferred_element_type=jnp.float32
    ).astype(o_ref.dtype)


def _mm_bias_kernel_ktiled(x_ref, w_ref, b_ref, o_ref, acc_ref):
    k = pl.program_id(2)

    @pl.when(k == 0)
    def _():
        acc_ref[...] = jnp.zeros_like(acc_ref)

    acc_ref[...] += jnp.dot(
        x_ref[...], w_ref[...], preferred_element_type=jnp.float32
    )

    @pl.when(k == pl.num_programs(2) - 1)
    def _():
        # Bias add + cast only once, in the finalize step.
        o_ref[...] = (acc_ref[...] + b_ref[...]).astype(o_ref.dtype)


def _mm_nobias_kernel_ktiled(x_ref, w_ref, o_ref, acc_ref):
    k = pl.program_id(2)

    @pl.when(k == 0)
    def _():
        acc_ref[...] = jnp.zeros_like(acc_ref)

    acc_ref[...] += jnp.dot(
        x_ref[...], w_ref[...], preferred_element_type=jnp.float32
    )

    @pl.when(k == pl.num_programs(2) - 1)
    def _():
        o_ref[...] = acc_ref[...].astype(o_ref.dtype)


# ---------------------------------------------------------------------------
# Tiling heuristics
# ---------------------------------------------------------------------------
def _round_up(v, a):
    return ((v + a - 1) // a) * a


def _cdiv(a, b):
    return -(-a // b)


def _vmem_budget_bytes():
    """~75% of physical VMEM: ~48 MiB on v7x (64 MiB), ~96 MiB on v5e/v6e (128 MiB)."""
    cap = 64 * 1024 * 1024  # conservative fallback = v7x per-TC VMEM
    try:
        cap = int(pltpu.get_tpu_info().vmem_capacity_bytes)
    except Exception:
        pass
    return max((cap * 3) // 4, 16 * 1024 * 1024)


def _tile_footprint(tm, tn, tk, x_item, w_item, out_item, has_bias, with_acc):
    byt = 2 * (tm * tk * x_item + tk * tn * w_item)  # double-buffered X / W tiles
    byt += 2 * tm * tn * out_item                    # double-buffered output tile
    if with_acc:
        byt += tm * tn * 4                           # f32 accumulator scratch
    if has_bias:
        byt += 2 * tn * 4                            # f32 bias tile
    return byt


def _choose_tiles(m, d_out, d_in, sub, x_item, w_item, out_item, has_bias,
                  budget, tm=None, tn=None, tk=None):
    mp_a = _round_up(m, sub)
    np_a = _round_up(d_out, 128)
    kp_a = _round_up(d_in, 128)

    # M / N tiles: cover the whole axis when modest (weight / X streamed from
    # HBM exactly once), otherwise large MXU-aligned panels.
    if tm is None:
        tm = mp_a if mp_a <= 1024 else 512
    tm = max(sub, min(_round_up(tm, sub), mp_a))
    if tn is None:
        tn = np_a if np_a <= 1024 else 512
    tn = max(128, min(_round_up(tn, 128), np_a))

    # K tile: collapse the K grid axis entirely when the full panel fits VMEM.
    if tk is None:
        if _tile_footprint(tm, tn, kp_a, x_item, w_item, out_item,
                           has_bias, False) <= budget:
            tk = kp_a
        else:
            tk = min(2048, kp_a)
    else:
        tk = max(128, min(_round_up(tk, 128), kp_a))
    collapse_k = tk >= kp_a

    # Shrink until the working set fits the budget (rarely triggers).
    def _fits():
        return _tile_footprint(tm, tn, tk, x_item, w_item, out_item,
                               has_bias, not collapse_k) <= budget

    while not _fits():
        if tk > 512:
            tk = max(512, _round_up(tk // 2, 128))
            collapse_k = tk >= kp_a
        elif tm >= tn and tm > max(sub, 128):
            tm = max(sub, _round_up(tm // 2, sub))
        elif tn > 128:
            tn = max(128, _round_up(tn // 2, 128))
        elif tm > sub:
            tm = max(sub, _round_up(tm // 2, sub))
        else:
            break

    # Megacore (v7x has 2 TensorCores): make sure the parallel (M,N) grid has
    # at least 2 steps for non-trivial problems so both cores get work.
    if _cdiv(mp_a, tm) * _cdiv(np_a, tn) < 2 and m * d_out > 128 * 256:
        if np_a >= 256 and (m <= d_out or mp_a < 2 * sub):
            tn = max(128, _round_up(np_a // 2, 128))       # re-read X, W once
        elif mp_a >= 2 * sub:
            tm = max(sub, _round_up(_cdiv(mp_a, 2), sub))   # re-read W, X once

    return tm, tn, tk, collapse_k


# ---------------------------------------------------------------------------
# Wrapper
# ---------------------------------------------------------------------------
def linear_pallas(x, weight, bias=None, *, tm=None, tn=None, tk=None):
    """Matches torch: output = X @ weight.T (+ bias). X may be 2-D or 3-D."""
    d_out, d_in = weight.shape
    if x.ndim not in (2, 3):
        raise ValueError(f"Unsupported input shape: {x.shape}")
    assert x.shape[-1] == d_in
    lead = x.shape[:-1]
    m = math.prod(lead)
    x2d = x.reshape(m, d_in)

    x_item = jnp.dtype(x.dtype).itemsize
    w_item = jnp.dtype(weight.dtype).itemsize
    out_item = x_item
    sub = max(8, 32 // x_item)  # sublane packing: 8 f32, 16 bf16, 32 int8/fp8
    has_bias = bias is not None

    budget = _vmem_budget_bytes()
    tm, tn, tk, collapse_k = _choose_tiles(
        m, d_out, d_in, sub, x_item, w_item, out_item, has_bias, budget,
        tm=tm, tn=tn, tk=tk)

    mp = _round_up(m, tm)
    np_ = _round_up(d_out, tn)
    kp = _round_up(d_in, tk)

    # Zero-pad to tile multiples (zero K-padding is exact).
    if (mp, kp) != (m, d_in):
        x2d = jnp.pad(x2d, ((0, mp - m), (0, kp - d_in)))
    # Pre-transpose the weight once so every kernel sees a native (K, N) RHS.
    # TODO(synk): in a real model, store the weight pre-transposed / pre-padded
    # at parameter init so this copy is not paid on every forward call.
    w_t = weight.T
    if (kp, np_) != (d_in, d_out):
        w_t = jnp.pad(w_t, ((0, kp - d_in), (0, np_ - d_out)))

    gm, gn, gk = mp // tm, np_ // tn, kp // tk

    # Advisory cost estimate (accounts for operand re-streaming).
    cost = pl.CostEstimate(
        flops=2 * m * d_in * d_out,
        transcendentals=0,
        bytes_accessed=(
            gn * m * d_in * x_item          # X panel read once per N tile
            + gm * d_out * d_in * w_item    # W panel read once per M tile
            + (d_out * 4 if has_bias else 0)
            + m * d_out * out_item
        ),
    )

    if collapse_k:
        x_spec = pl.BlockSpec((tm, kp), lambda i, j: (i, 0))
        w_spec = pl.BlockSpec((kp, tn), lambda i, j: (0, j))
        b_spec = pl.BlockSpec((1, tn), lambda i, j: (0, j))
        o_spec = pl.BlockSpec((tm, tn), lambda i, j: (i, j))
        grid = (gm, gn)
        scratch = []
        dims = ("parallel", "parallel")
        kern = _mm_bias_kernel if has_bias else _mm_nobias_kernel
    else:
        x_spec = pl.BlockSpec((tm, tk), lambda i, j, k: (i, k))
        w_spec = pl.BlockSpec((tk, tn), lambda i, j, k: (k, j))
        b_spec = pl.BlockSpec((1, tn), lambda i, j, k: (0, j))
        o_spec = pl.BlockSpec((tm, tn), lambda i, j, k: (i, j))
        grid = (gm, gn, gk)
        scratch = [pltpu.VMEM((tm, tn), jnp.float32)]
        dims = ("parallel", "parallel", "arbitrary")
        kern = _mm_bias_kernel_ktiled if has_bias else _mm_nobias_kernel_ktiled

    in_specs = [x_spec, w_spec]
    operands = [x2d, w_t]
    if has_bias:
        bias2d = bias.reshape(1, d_out).astype(jnp.float32)
        if np_ != d_out:
            bias2d = jnp.pad(bias2d, ((0, 0), (0, np_ - d_out)))
        in_specs.append(b_spec)
        operands.append(bias2d)

    out_p = pl.pallas_call(
        kern,
        out_shape=jax.ShapeDtypeStruct((mp, np_), x.dtype),
        grid_spec=pltpu.PrefetchScalarGridSpec(
            num_scalar_prefetch=0,
            grid=grid,
            in_specs=in_specs,
            out_specs=o_spec,
            scratch_shapes=scratch,
        ),
        compiler_params=pltpu.CompilerParams(
            dimension_semantics=dims,
            vmem_limit_bytes=budget,
        ),
        cost_estimate=cost,
    )(*operands)

    return out_p[:m, :d_out].reshape(*lead, d_out)


# ---------------------------------------------------------------------------
# Parameter init (Xavier-uniform weight + torch-style uniform bias)
# ---------------------------------------------------------------------------
def init_linear_params(key, d_in, d_out, bias=True):
    kw, kb = jax.random.split(key)
    wbound = math.sqrt(6.0 / (d_in + d_out))  # Xavier uniform
    weight = jax.random.uniform(
        kw, (d_out, d_in), minval=-wbound, maxval=wbound, dtype=jnp.float32
    )
    b = None
    if bias:
        bbound = 1.0 / math.sqrt(d_in)
        b = jax.random.uniform(
            kb, (d_out,), minval=-bbound, maxval=bbound, dtype=jnp.float32
        )
    return weight, b


if __name__ == "__main__":
    key = jax.random.PRNGKey(0)
    k_x, k_p, k_x2, k_p2 = jax.random.split(key, 4)

    # --- small 3-D / 2-D sanity check (collapsed-K, bias path) -------------
    batch, len_seq, d_in, d_out = 2, 8, 32, 64
    x = jax.random.normal(k_x, (batch, len_seq, d_in), dtype=jnp.float32)
    weight, bias = init_linear_params(k_p, d_in, d_out, bias=True)

    out = jax.block_until_ready(linear_pallas(x, weight, bias))
    ref = jnp.matmul(x, weight.T) + bias
    assert out.shape == (batch, len_seq, d_out)
    assert jnp.allclose(out, ref, atol=2e-3, rtol=2e-3)

    x2 = x[:, 0, :]
    out2 = jax.block_until_ready(linear_pallas(x2, weight, bias))
    ref2 = jnp.matmul(x2, weight.T) + bias
    assert out2.shape == (batch, d_out)
    assert jnp.allclose(out2, ref2, atol=2e-3, rtol=2e-3)

    # --- explicit small tiles: K-tiled accumulator path + K/N padding ------
    m3, k3, n3 = 256, 320, 384
    x3 = jax.random.normal(k_x2, (m3, k3), dtype=jnp.float32)
    w3, b3 = init_linear_params(k_p2, k3, n3, bias=True)
    out3 = jax.block_until_ready(linear_pallas(x3, w3, b3, tm=128, tn=128, tk=128))
    ref3 = jnp.matmul(x3, w3.T) + b3
    assert out3.shape == (m3, n3)
    assert jnp.allclose(out3, ref3, atol=2e-3, rtol=2e-3)

    out3b = jax.block_until_ready(linear_pallas(x3, w3, None, tm=128, tn=128, tk=128))
    ref3b = jnp.matmul(x3, w3.T)
    assert jnp.allclose(out3b, ref3b, atol=2e-3, rtol=2e-3)

    # --- auto tiles: collapsed-K, multi-tile parallel grid, no-bias --------
    out4 = jax.block_until_ready(linear_pallas(x3, w3, None))
    assert jnp.allclose(out4, ref3b, atol=2e-3, rtol=2e-3)

    print("KERNEL_OK")
</pallas_src>

<mosaic_0001>
module attributes {stable_mosaic.version = 11 : i64} {
  func.func @_mm_bias_kernel(%arg0: i32, %arg1: i32, %arg2: memref<16x128xf32, #tpu.memory_space<vmem>>, %arg3: memref<128x128xf32, #tpu.memory_space<vmem>>, %arg4: memref<1x128xf32, #tpu.memory_space<vmem>>, %arg5: memref<16x128xf32, #tpu.memory_space<vmem>>) attributes {dimension_semantics = [#tpu.dimension_semantics<parallel>, #tpu.dimension_semantics<parallel>], iteration_bounds = array<i64: 1, 1>, scalar_prefetch = 0 : i64, scratch_operands = 0 : i64, tpu.core_type = #tpu.core_type<tc>, window_params = [{transform_indices = @transform_0, window_bounds = array<i64: 16, 128>}, {transform_indices = @transform_1, window_bounds = array<i64: 128, 128>}, {transform_indices = @transform_2, window_bounds = array<i64: 1, 128>}, {transform_indices = @transform_3, window_bounds = array<i64: 16, 128>}]} {
    %c0 = arith.constant 0 : index
    %c0_0 = arith.constant 0 : index
    %0 = vector.load %arg2[%c0, %c0_0] : memref<16x128xf32, #tpu.memory_space<vmem>>, vector<16x128xf32>
    %c0_1 = arith.constant 0 : index
    %c0_2 = arith.constant 0 : index
    %1 = vector.load %arg3[%c0_1, %c0_2] : memref<128x128xf32, #tpu.memory_space<vmem>>, vector<128x128xf32>
    %cst = arith.constant dense<0.000000e+00> : vector<16x128xf32>
    %2 = tpu.matmul %0, %1, %cst {dimension_numbers = #tpu.dot_dimension_numbers<[1], [0], [0], [1], [0, 0, 1, 1], [], []>} : vector<16x128xf32>, vector<128x128xf32>, vector<16x128xf32> -> vector<16x128xf32>
    %c0_3 = arith.constant 0 : index
    %c0_4 = arith.constant 0 : index
    %3 = vector.load %arg4[%c0_3, %c0_4] : memref<1x128xf32, #tpu.memory_space<vmem>>, vector<1x128xf32>
    %4 = vector.broadcast %3 : vector<1x128xf32> to vector<16x128xf32>
    %5 = arith.addf %2, %4 : vector<16x128xf32>
    %c0_5 = arith.constant 0 : index
    %c0_6 = arith.constant 0 : index
    %6 = vector.load %arg5[%c0_5, %c0_6] : memref<16x128xf32, #tpu.memory_space<vmem>>, vector<16x128xf32>
    tpu.vector_store %arg5[%c0_5, %c0_6], %5 {strides = array<i32>} : memref<16x128xf32, #tpu.memory_space<vmem>>, vector<16x128xf32>,
    return
  }
  func.func @transform_0(%arg0: i32, %arg1: i32) -> (i32, i32) {
    %c0_i32 = arith.constant 0 : i32
    %c0_i32_0 = arith.constant 0 : i32
    return %arg0, %c0_i32 : i32, i32
  }
  func.func @transform_1(%arg0: i32, %arg1: i32) -> (i32, i32) {
    %c0_i32 = arith.constant 0 : i32
    %c0_i32_0 = arith.constant 0 : i32
    return %c0_i32, %arg1 : i32, i32
  }
  func.func @transform_2(%arg0: i32, %arg1: i32) -> (i32, i32) {
    %c0_i32 = arith.constant 0 : i32
    %c0_i32_0 = arith.constant 0 : i32
    return %c0_i32, %arg1 : i32, i32
  }
  func.func @transform_3(%arg0: i32, %arg1: i32) -> (i32, i32) {
    %c0_i32 = arith.constant 0 : i32
    return %arg0, %arg1 : i32, i32
  }
}

</mosaic_0001>

<bundles_post_ra>
// kernel: tpu_custom_call.1
= control target key start
LH: loop header
LB: loop body
LE: loop exit
PB: predicated region body
PF: predicated region fallthrough
CT: control target
= control target key end

     0   :  { %8 = vsyncpa [#allocation3], 0  ;;  %s260_s0 = inlined_call_operand.hbm [shape: f32[16,128], index: 0, kind: input, shape index: {}]   ;;  %s261_s1 = inlined_call_operand.hbm [shape: f32[128,128], index: 1, kind: input, shape index: {}]   ;;  %s262_s2 = inlined_call_operand.vmem [shape: f32[1,128], index: 2, kind: input, shape index: {}]   ;;  %s263_s3 = inlined_call_operand.hbm [shape: f32[16,128], index: 3, kind: output, shape index: {}]  }
   0x1   :  { %9 = vsyncpa [#allocation6], 0 }
   0x2   :  { %10 = vsyncpa [#allocation4], 0  ;;  %s15_s14 = sshll.u32 %s260_s0, 4  ;;  %s214_s15 = smov [#allocation2]   ;;  %s16_s14 = int_to_ptr.hbm [resolvable:$true] %s15_s14 }
   0x3   :  { %s17_s16 = sshll.u32 %s214_s15, 4  ;;  %s28_s19 = sshll.u32 %s261_s1, 4  ;;  %s18_s16 = int_to_ptr.vmem [resolvable:$true] %s17_s16  ;;  %s29_s19 = int_to_ptr.hbm [resolvable:$true] %s28_s19 }
   0x4   :  { %s215_s20 = smov 128   ;;  %s216_s21 = smov 8  }
   0x5   :  { %23 = dma.hbm_to_vmem [thread:$0]  %s16_s14, 256, %s18_s16, [#allocation3], %s215_s20, %s215_s20, %s216_s21  }
   0x6   :  { %s217_s22 = smov [#allocation5]  }
   0x7   :  { %s30_s23 = sshll.u32 %s217_s22, 4  ;;  %s31_s23 = int_to_ptr.vmem [resolvable:$true] %s30_s23 }
   0x8   :  { %36 = dma.hbm_to_vmem [thread:$0]  %s29_s19, 2048, %s31_s23, [#allocation6], %s215_s20, %s215_s20, %s216_s21  }
   0x9   :  { %208 = dma.done.wait [#allocation3], 256  }
   0xa   :  { %209 = vsyncadd [#allocation3], 4294967040 }
   0xb   :  { %210 = dma.done.wait [#allocation6], 2048  }
   0xc   :  { %211 = vsyncadd [#allocation6], 4294965248  ;;  %v64_v0 = vld [vmem:[#allocation5 + $0x78] sm:$0xff]  ;;  %v63_v1 = vld [vmem:[#allocation5 + $0x70] sm:$0xff]  ;;  %s218_s24 = smov [#allocation7]   ;;  %s100_s28 = sshll.u32 %s263_s3, 4  ;;  %s101_s28 = int_to_ptr.hbm [resolvable:$true] %s100_s28 }
   0xd   :  { %69 = vmatpush.msra.mxu0 %v64_v0  ;;  %114 = vmatpush.msra.mxu1 %v64_v0  ;;  %v62_v2 = vld [vmem:[#allocation5 + $0x68] sm:$0xff]  ;;  %v61_v3 = vld [vmem:[#allocation5 + $0x60] sm:$0xff]  ;;  %v60_v4 = vld [vmem:[#allocation5 + $0x58] sm:$0xff]  ;;  %s98_s25 = sshll.u32 %s218_s24, 4  ;;  %s99_s25 = int_to_ptr.vmem [resolvable:$true] %s98_s25 }
   0xe   :  { %v59_v5 = vld [vmem:[#allocation5 + $0x50] sm:$0xff]  ;;  %v58_v6 = vld [vmem:[#allocation5 + $0x48] sm:$0xff]  ;;  %v57_v7 = vld [vmem:[#allocation5 + $0x40] sm:$0xff] }
   0xf   :  { %70 = vmatpush.msra.mxu0 %v63_v1  ;;  %115 = vmatpush.msra.mxu1 %v63_v1  ;;  %v56_v8 = vld [vmem:[#allocation5 + $0x38] sm:$0xff]  ;;  %v55_v9 = vld [vmem:[#allocation5 + $0x30] sm:$0xff]  ;;  %v54_v10 = vld [vmem:[#allocation5 + $0x28] sm:$0xff] }
  0x10   :  { %v53_v11 = vld [vmem:[#allocation5 + $0x20] sm:$0xff]  ;;  %v52_v12 = vld [vmem:[#allocation5 + $0x18] sm:$0xff]  ;;  %v51_v13 = vld [vmem:[#allocation5 + $0x10] sm:$0xff] }
  0x11   :  { %71 = vmatpush.msra.mxu0 %v62_v2  ;;  %116 = vmatpush.msra.mxu1 %v62_v2  ;;  %v50_v14 = vld [vmem:[#allocation5 + $0x8] sm:$0xff]  ;;  %v49_v15 = vld [vmem:[#allocation5] sm:$0xff]  ;;  %v47_v16 = vld [vmem:[#allocation2] sm:$0xff] }
  0x12   :  { %v48_v17 = vld [vmem:[#allocation2 + $0x8] sm:$0xff]  ;;  %v135_v18 = vld [vmem:[%s262_s2] ss:$0 sm:$0xff] }
  0x13   :  { %72 = vmatpush.msra.mxu0 %v61_v3  ;;  %117 = vmatpush.msra.mxu1 %v61_v3 }
  0x15   :  { %73 = vmatpush.msra.mxu0 %v60_v4  ;;  %118 = vmatpush.msra.mxu1 %v60_v4 }
  0x17   :  { %74 = vmatpush.msra.mxu0 %v59_v5  ;;  %119 = vmatpush.msra.mxu1 %v59_v5 }
  0x19   :  { %75 = vmatpush.msra.mxu0 %v58_v6  ;;  %120 = vmatpush.msra.mxu1 %v58_v6 }
  0x1b   :  { %76 = vmatpush.msra.mxu0 %v57_v7  ;;  %121 = vmatpush.msra.mxu1 %v57_v7 }
  0x1d   :  { %77 = vmatpush.msra.mxu0 %v56_v8  ;;  %122 = vmatpush.msra.mxu1 %v56_v8 }
  0x1f   :  { %78 = vmatpush.msra.mxu0 %v55_v9  ;;  %123 = vmatpush.msra.mxu1 %v55_v9 }
  0x21   :  { %79 = vmatpush.msra.mxu0 %v54_v10  ;;  %124 = vmatpush.msra.mxu1 %v54_v10 }
  0x23   :  { %80 = vmatpush.msra.mxu0 %v53_v11  ;;  %125 = vmatpush.msra.mxu1 %v53_v11 }
  0x25   :  { %81 = vmatpush.msra.mxu0 %v52_v12  ;;  %126 = vmatpush.msra.mxu1 %v52_v12 }
  0x27   :  { %82 = vmatpush.msra.mxu0 %v51_v13  ;;  %127 = vmatpush.msra.mxu1 %v51_v13 }
  0x29   :  { %83 = vmatpush.msra.mxu0 %v50_v14  ;;  %128 = vmatpush.msra.mxu1 %v50_v14 }
  0x2b   :  { %84 = vmatpush.msra.mxu0 %v49_v15  ;;  %129 = vmatpush.msra.mxu1 %v49_v15 }
  0x2c   :  { %85 = vmatmul.f32.vlgmr.msra.gmra.mxu0 %v47_v16  ;;  %88 = vmatmul.f32.vlgmr.msra.gmra.mxu1 %v48_v17 }
  0xa9   :  { %v86_v19 = vpop.f32.mrf.mxu0  ;;  %v89_v20 = vpop.f32.mrf.mxu1 }
  0xaa   :  { %v87_v21 = vadd.f32 %v135_v18, %v86_v19  ;;  %v90_v22 = vadd.f32 %v135_v18, %v89_v20 }
  0xac   :  { %92 = vst [vmem:[#allocation7] sm:$0xff] %v87_v21 }
  0xad   :  { %93 = vst [vmem:[#allocation7 + $0x8] sm:$0xff] %v90_v22 }
  0xae   :  { %106 = dma.vmem_to_hbm [thread:$0]  %s99_s25, 256, %s101_s28, [#allocation4], %s215_s20, %s215_s20, %s216_s21  }
  0xaf   :  { %212 = dma.done.wait [#allocation4], 256  }
  0xb0   :  { %213 = vsyncadd [#allocation4], 4294967040 }
  0xb1   :  { %111 = vsyncpa [#allocation3], 1 }
  0xb2   :  { %112 = vsyncpa [#allocation6], 1 }
  0xb3   :  { %113 = vsyncpa [#allocation4], 1 }

</bundles_post_ra>
